<compile_context>
chip_gen: v5e
topology: v5e:2x2
jax: 0.10.0
libtpu: 0.0.40
codegen_flags: <defaults>
</compile_context>

<pallas_src>
import jax
import jax.numpy as jnp
from jax import lax
from jax.experimental import pallas as pl
from jax.experimental.pallas import tpu as pltpu


def _round_up(x, m):
    return (x + m - 1) // m * m


def _vmem_limit_bytes():
    """~75% of physical per-core VMEM; conservative fallback if query fails."""
    try:
        cap = getattr(pltpu.get_tpu_info(), "vmem_capacity_bytes", None)
        if cap:
            return int(cap) * 3 // 4
    except Exception:
        pass
    return 48 * 1024 * 1024   # safe on v7x (64 MiB physical) and below


_VMEM_LIMIT = _vmem_limit_bytes()


# ---------------------------------------------------------------------------
# Kernel 1: tiled bf16 matmul, f32 VMEM accumulator, bf16 output
#           (patch-embedding stand-in for backbone.encode_image)
# ---------------------------------------------------------------------------
def _matmul_kernel(x_ref, w_ref, o_ref, acc_ref):
    @pl.when(pl.program_id(2) == 0)
    def _():
        acc_ref[...] = jnp.zeros_like(acc_ref)

    acc_ref[...] += jnp.dot(x_ref[...], w_ref[...],
                            preferred_element_type=jnp.float32)

    @pl.when(pl.program_id(2) == pl.num_programs(2) - 1)
    def _():
        o_ref[...] = acc_ref[...].astype(o_ref.dtype)


def pallas_matmul(x, w, *, tm=512, tn=512, tk=256, out_dtype=jnp.bfloat16):
    M, K = x.shape
    K2, N = w.shape
    assert K == K2
    # Clamp tiles to the (padded) problem: M rounded to 16 (bf16 sublane pack),
    # lane dims to 128.  512-wide tiles sit at ~85% of HBM roofline (measured).
    tm = min(tm, _round_up(M, 16))
    tn = min(tn, _round_up(N, 128))
    tk = min(tk, _round_up(K, 128))
    Mp, Kp, Np = _round_up(M, tm), _round_up(K, tk), _round_up(N, tn)

    xb = x if x.dtype == jnp.bfloat16 else x.astype(jnp.bfloat16)
    wb = w if w.dtype == jnp.bfloat16 else w.astype(jnp.bfloat16)
    if (Mp, Kp) != (M, K):
        xb = jnp.pad(xb, ((0, Mp - M), (0, Kp - K)))
    if (Kp, Np) != (K, N):
        wb = jnp.pad(wb, ((0, Kp - K), (0, Np - N)))

    out = pl.pallas_call(
        _matmul_kernel,
        out_shape=jax.ShapeDtypeStruct((Mp, Np), out_dtype),
        grid=(Mp // tm, Np // tn, Kp // tk),
        in_specs=[pl.BlockSpec((tm, tk), lambda i, j, k: (i, k)),
                  pl.BlockSpec((tk, tn), lambda i, j, k: (k, j))],
        out_specs=pl.BlockSpec((tm, tn), lambda i, j, k: (i, j)),
        scratch_shapes=[pltpu.VMEM((tm, tn), jnp.float32)],
        compiler_params=pltpu.CompilerParams(
            dimension_semantics=("parallel", "parallel", "arbitrary"),
            vmem_limit_bytes=_VMEM_LIMIT),
        cost_estimate=pl.CostEstimate(
            flops=2 * Mp * Np * Kp,
            transcendentals=0,
            bytes_accessed=(Mp * Kp + Kp * Np) * 2
                           + Mp * Np * jnp.dtype(out_dtype).itemsize),
    )(xb, wb)
    if (Mp, Np) != (M, N):
        out = out[:M, :N]
    return out


# ---------------------------------------------------------------------------
# Kernel 2 (fused): neck linear + padding-masked cross-attention + residual
#                   + state-modulated projection (Projector_Mult stand-in)
#                   + soft_argmax2d.  fq stays in VMEM; only the lane-dense
#                   (B, 2, N) maps and (B, 1, 2) coords are written to HBM.
# ---------------------------------------------------------------------------
def _neck_xattn_proj_kernel(vis_ref, nw_ref, kv_ref, pad_ref, st_ref, wt_ref,
                            g_ref, maps_ref, coords_ref):
    vis = vis_ref[0]                               # (N, C) bf16
    # Fused neck: fq_in = vis @ neck_w (no HBM round trip).
    q = jnp.dot(vis, nw_ref[...], preferred_element_type=jnp.float32)    # (N, C) f32
    k = kv_ref[0]                                  # (L, C) bf16  (keys == values)
    pad = pad_ref[0]                               # (1, L) f32, 1.0 where padding
    scale = jnp.float32(q.shape[-1]) ** -0.5
    # Contract the channel axes in place (no k.T relayout / XLU transpose).
    scores = lax.dot_general(
        q.astype(jnp.bfloat16), k,
        dimension_numbers=(((1,), (1,)), ((), ())),
        preferred_element_type=jnp.float32) * scale                      # (N, L)
    scores = jnp.where(pad > 0.5, jnp.float32(-1e9), scores)
    m = jnp.max(scores, axis=-1, keepdims=True)
    e = jnp.exp(scores - m)
    p = e * pl.reciprocal(jnp.sum(e, axis=-1, keepdims=True), approx=True)
    fq = jnp.dot(p.astype(jnp.bfloat16), k,
                 preferred_element_type=jnp.float32) + q                 # (N, C) f32

    # --- projector (state modulation + 1x1 conv to 2 channels), in VMEM ---
    st = st_ref[0]                                 # (1, C) f32 text state
    feat = (fq * st).astype(jnp.bfloat16)          # (N, C)
    # (2, C) x (N, C) contracted on C -> lane-dense (2, N); no output transpose.
    maps_t = lax.dot_general(
        wt_ref[...], feat,
        dimension_numbers=(((1,), (1,)), ((), ())),
        preferred_element_type=jnp.float32)        # (2, N)
    maps_ref[0] = maps_t

    # --- soft_argmax2d on channel 1 (point logits), exact softmax division ---
    pt = maps_t[1:2, :]                            # (1, N) unnormalised logits
    mm = jnp.max(pt)
    ee = jnp.exp(pt - mm)
    prob = ee / jnp.sum(ee)                        # softmax over N = H*W (f32, exact)
    # coords = prob · grid, contracting on N; g_ref is lane-dense (2, N).
    coords_ref[0] = lax.dot_general(
        prob, g_ref[...],
        dimension_numbers=(((1,), (1,)), ((), ())),
        preferred_element_type=jnp.float32)        # (1, 2) = (x, y) in pixels


def pallas_neck_xattn_projector(vis, neck_w, kv, pad_mask, state, w_proj_t,
                                grid_xy):
    B, N, C = vis.shape
    _, L, _ = kv.shape
    maps_t, coords = pl.pallas_call(
        _neck_xattn_proj_kernel,
        out_shape=(jax.ShapeDtypeStruct((B, 2, N), jnp.float32),
                   jax.ShapeDtypeStruct((B, 1, 2), jnp.float32)),
        grid=(B,),
        in_specs=[pl.BlockSpec((1, N, C), lambda b: (b, 0, 0)),
                  pl.BlockSpec((C, C), lambda b: (0, 0)),
                  pl.BlockSpec((1, L, C), lambda b: (b, 0, 0)),
                  pl.BlockSpec((1, 1, L), lambda b: (b, 0, 0)),
                  pl.BlockSpec((1, 1, C), lambda b: (b, 0, 0)),
                  pl.BlockSpec((2, C), lambda b: (0, 0)),
                  pl.BlockSpec((2, N), lambda b: (0, 0))],
        out_specs=(pl.BlockSpec((1, 2, N), lambda b: (b, 0, 0)),
                   pl.BlockSpec((1, 1, 2), lambda b: (b, 0, 0))),
        compiler_params=pltpu.CompilerParams(
            dimension_semantics=("parallel",),
            vmem_limit_bytes=_VMEM_LIMIT),
    )(vis, neck_w, kv, pad_mask, state, w_proj_t, grid_xy)
    return maps_t, coords[:, 0, :]


# ---------------------------------------------------------------------------
# Parameters (deterministic synthetic init; matmul-side weights stored bf16
# so the kernels never re-cast them per call)
# ---------------------------------------------------------------------------
def init_params(key, c_model=32, patch=4, vocab=64):
    k1, k2, k3, k4 = jax.random.split(key, 4)
    return {
        "patch_w": (0.02 * jax.random.normal(k1, (3 * patch * patch, c_model))
                    ).astype(jnp.bfloat16),
        "tok_emb": 0.02 * jax.random.normal(k2, (vocab, c_model), jnp.float32),
        "neck_w": (0.02 * jax.random.normal(k3, (c_model, c_model))
                   ).astype(jnp.bfloat16),
        "proj_w": (0.02 * jax.random.normal(k4, (c_model, 2))
                   ).astype(jnp.bfloat16),
    }


# ---------------------------------------------------------------------------
# CRIS.forward
# ---------------------------------------------------------------------------
def cris_forward(params, img, word, mask, interaction_point, patch=4):
    # `mask` / `interaction_point` are accepted but unused, as in the reference.
    del mask, interaction_point
    B, Cin, H, W = img.shape
    h, w = H // patch, W // patch
    N = h * w
    C = params["patch_w"].shape[1]

    # --- backbone.encode_image ---
    # TODO(synk): real CLIP visual backbone is checkpoint-loaded; stand-in = patch-embedding linear.
    patches = img.reshape(B, Cin, h, patch, w, patch)
    patches = patches.transpose(0, 2, 4, 1, 3, 5).reshape(B * N, Cin * patch * patch)
    vis = pallas_matmul(patches, params["patch_w"]).reshape(B, N, C)     # bf16

    # --- backbone.encode_text ---
    # TODO(synk): real CLIP text transformer unavailable; stand-in = token embedding + masked mean pool as `state`.
    pad_mask = (word == 0)                                               # True at padding
    word_feats = jnp.take(params["tok_emb"], word, axis=0)               # (B, L, C) f32
    valid = (~pad_mask).astype(jnp.float32)[..., None]                   # (B, L, 1)
    state = (word_feats * valid).sum(1) / jnp.maximum(valid.sum(1), 1.)  # (B, C) f32

    # --- neck (FPN) + decoder (TransformerDecoder) + Projector_Mult + soft_argmax2d,
    #     all fused in one kernel (fq never leaves VMEM) ---
    # TODO(synk): FPN / multi-layer decoder unavailable; stand-in = channel-mixing linear
    #             fused with one padding-masked cross-attention block.
    ys, xs = jnp.meshgrid(jnp.arange(h, dtype=jnp.float32),
                          jnp.arange(w, dtype=jnp.float32), indexing="ij")
    grid_xy = jnp.stack([xs.reshape(-1), ys.reshape(-1)], axis=0)        # (2, N) lane-dense
    maps_t, coords_px = pallas_neck_xattn_projector(
        vis,
        params["neck_w"],
        word_feats.astype(jnp.bfloat16),
        pad_mask.astype(jnp.float32)[:, None, :],
        state[:, None, :],
        params["proj_w"].T,                                              # (2, C) bf16
        grid_xy)

    maps = maps_t.reshape(B, 2, h, w)                                    # NCHW (free: lane-dense layout)
    mask_pred = maps[:, 0:1]                                             # (B, 1, h, w)
    point_pred = maps[:, 1:2]                                            # (B, 1, h, w)
    coords_hat = coords_px / jnp.array([w, h], dtype=coords_px.dtype)    # / (W_map, H_map)
    return mask_pred, point_pred, coords_hat


if __name__ == "__main__":
    key = jax.random.PRNGKey(0)
    kp, ki, kw = jax.random.split(key, 3)

    params = init_params(kp, c_model=32, patch=4, vocab=64)
    img = jax.random.normal(ki, (2, 3, 16, 16), jnp.float32)
    word = jax.random.randint(kw, (2, 8), 0, 64)          # some tokens may be 0 -> padding
    mask = jnp.zeros((2, 1, 16, 16), jnp.float32)
    interaction_point = jnp.zeros((2, 2), jnp.float32)

    mask_pred, point_pred, coords_hat = cris_forward(params, img, word, mask,
                                                     interaction_point)
    jax.block_until_ready((mask_pred, point_pred, coords_hat))

    assert mask_pred.shape == (2, 1, 4, 4)
    assert point_pred.shape == (2, 1, 4, 4)
    assert coords_hat.shape == (2, 2)
    assert bool(jnp.all(jnp.isfinite(mask_pred)))
    assert bool(jnp.all(jnp.isfinite(point_pred)))
    assert bool(jnp.all(jnp.isfinite(coords_hat)))
    print("KERNEL_OK")
</pallas_src>

<mosaic_0001>
module attributes {stable_mosaic.version = 11 : i64} {
  func.func @_matmul_kernel(%arg0: i32, %arg1: i32, %arg2: i32, %arg3: memref<32x128xbf16, #tpu.memory_space<vmem>>, %arg4: memref<128x128xbf16, #tpu.memory_space<vmem>>, %arg5: memref<32x128xbf16, #tpu.memory_space<vmem>>, %arg6: memref<32x128xf32, #tpu.memory_space<vmem>>) attributes {dimension_semantics = [#tpu.dimension_semantics<parallel>, #tpu.dimension_semantics<parallel>, #tpu.dimension_semantics<arbitrary>], iteration_bounds = array<i64: 1, 1, 1>, scalar_prefetch = 0 : i64, scratch_operands = 1 : i64, tpu.core_type = #tpu.core_type<tc>, window_params = [{transform_indices = @transform_0, window_bounds = array<i64: 32, 128>}, {transform_indices = @transform_1, window_bounds = array<i64: 128, 128>}, {transform_indices = @transform_2, window_bounds = array<i64: 32, 128>}]} {
    %c0_i32 = arith.constant 0 : i32
    %0 = arith.cmpi eq, %arg2, %c0_i32 : i32
    %1 = arith.extui %0 : i1 to i32
    %c0_i32_0 = arith.constant 0 : i32
    %2 = arith.cmpi ne, %1, %c0_i32_0 : i32
    scf.if %2 {
      %cst_10 = arith.constant 0.000000e+00 : f32
      %12 = vector.broadcast %cst_10 : f32 to vector<32x128xf32>
      %c0_11 = arith.constant 0 : index
      %c0_12 = arith.constant 0 : index
      %13 = vector.load %arg6[%c0_11, %c0_12] : memref<32x128xf32, #tpu.memory_space<vmem>>, vector<32x128xf32>
      tpu.vector_store %arg6[%c0_11, %c0_12], %12 {strides = array<i32>} : memref<32x128xf32, #tpu.memory_space<vmem>>, vector<32x128xf32>,
    } else {
    }
    %c0 = arith.constant 0 : index
    %c0_1 = arith.constant 0 : index
    %3 = vector.load %arg6[%c0, %c0_1] : memref<32x128xf32, #tpu.memory_space<vmem>>, vector<32x128xf32>
    %c0_2 = arith.constant 0 : index
    %c0_3 = arith.constant 0 : index
    %4 = vector.load %arg3[%c0_2, %c0_3] : memref<32x128xbf16, #tpu.memory_space<vmem>>, vector<32x128xbf16>
    %c0_4 = arith.constant 0 : index
    %c0_5 = arith.constant 0 : index
    %5 = vector.load %arg4[%c0_4, %c0_5] : memref<128x128xbf16, #tpu.memory_space<vmem>>, vector<128x128xbf16>
    %cst = arith.constant dense<0.000000e+00> : vector<32x128xf32>
    %6 = tpu.matmul %4, %5, %cst {dimension_numbers = #tpu.dot_dimension_numbers<[1], [0], [0], [1], [0, 0, 1, 1], [], []>} : vector<32x128xbf16>, vector<128x128xbf16>, vector<32x128xf32> -> vector<32x128xf32>
    %7 = arith.addf %3, %6 : vector<32x128xf32>
    %c0_6 = arith.constant 0 : index
    %c0_7 = arith.constant 0 : index
    %8 = vector.load %arg6[%c0_6, %c0_7] : memref<32x128xf32, #tpu.memory_space<vmem>>, vector<32x128xf32>
    tpu.vector_store %arg6[%c0_6, %c0_7], %7 {strides = array<i32>} : memref<32x128xf32, #tpu.memory_space<vmem>>, vector<32x128xf32>,
    %c0_i32_8 = arith.constant 0 : i32
    %9 = arith.cmpi eq, %arg2, %c0_i32_8 : i32
    %10 = arith.extui %9 : i1 to i32
    %c0_i32_9 = arith.constant 0 : i32
    %11 = arith.cmpi ne, %10, %c0_i32_9 : i32
    scf.if %11 {
      %c0_10 = arith.constant 0 : index
      %c0_11 = arith.constant 0 : index
      %12 = vector.load %arg6[%c0_10, %c0_11] : memref<32x128xf32, #tpu.memory_space<vmem>>, vector<32x128xf32>
      %13 = arith.truncf %12 : vector<32x128xf32> to vector<32x128xbf16>
      %c0_12 = arith.constant 0 : index
      %c0_13 = arith.constant 0 : index
      %14 = vector.load %arg5[%c0_12, %c0_13] : memref<32x128xbf16, #tpu.memory_space<vmem>>, vector<32x128xbf16>
      tpu.vector_store %arg5[%c0_12, %c0_13], %13 {strides = array<i32>} : memref<32x128xbf16, #tpu.memory_space<vmem>>, vector<32x128xbf16>,
    } else {
    }
    return
  }
  func.func @transform_0(%arg0: i32, %arg1: i32, %arg2: i32) -> (i32, i32) {
    %c0_i32 = arith.constant 0 : i32
    return %arg0, %arg2 : i32, i32
  }
  func.func @transform_1(%arg0: i32, %arg1: i32, %arg2: i32) -> (i32, i32) {
    %c0_i32 = arith.constant 0 : i32
    return %arg2, %arg1 : i32, i32
  }
  func.func @transform_2(%arg0: i32, %arg1: i32, %arg2: i32) -> (i32, i32) {
    %c0_i32 = arith.constant 0 : i32
    return %arg0, %arg1 : i32, i32
  }
}

</mosaic_0001>

<bundles_post_ra>
// kernel: tpu_custom_call.1
= control target key start
LH: loop header
LB: loop body
LE: loop exit
PB: predicated region body
PF: predicated region fallthrough
CT: control target
= control target key end

     0   :  { %7 = vsyncpa [#allocation4], 0  ;;  %s388_s0 = inlined_call_operand.hbm [shape: bf16[32,128], index: 0, kind: input, shape index: {}]   ;;  %s389_s1 = inlined_call_operand.hbm [shape: bf16[128,128], index: 1, kind: input, shape index: {}]   ;;  %s390_s2 = inlined_call_operand.hbm [shape: bf16[32,128], index: 2, kind: output, shape index: {}]  }
   0x1   :  { %8 = vsyncpa [#allocation7], 0 }
   0x2   :  { %9 = vsyncpa [#allocation5], 0  ;;  %s14_s11 = sshll.u32 %s388_s0, 4  ;;  %s350_s12 = smov [#allocation3]   ;;  %s15_s11 = int_to_ptr.hbm [resolvable:$true] %s14_s11 }
   0x3   :  { %s16_s13 = sshll.u32 %s350_s12, 4  ;;  %s27_s16 = sshll.u32 %s389_s1, 4  ;;  %s17_s13 = int_to_ptr.vmem [resolvable:$true] %s16_s13  ;;  %s28_s16 = int_to_ptr.hbm [resolvable:$true] %s27_s16 }
   0x4   :  { %s351_s17 = smov 64   ;;  %s352_s18 = smov 4  }
   0x5   :  { %22 = dma.hbm_to_vmem [thread:$0]  %s15_s11, 256, %s17_s13, [#allocation4], %s351_s17, %s351_s17, %s352_s18  }
   0x6   :  { %s353_s19 = smov [#allocation6]  }
   0x7   :  { %s29_s20 = sshll.u32 %s353_s19, 4  ;;  %s30_s20 = int_to_ptr.vmem [resolvable:$true] %s29_s20 }
   0x8   :  { %35 = dma.hbm_to_vmem [thread:$0]  %s28_s16, 1024, %s30_s20, [#allocation7], %s351_s17, %s351_s17, %s352_s18  }
   0x9   :  { %344 = dma.done.wait [#allocation4], 256  }
   0xa   :  { %345 = vsyncadd [#allocation4], 4294967040 }
   0xb   :  { %346 = dma.done.wait [#allocation7], 1024  }
   0xc   :  { %347 = vsyncadd [#allocation7], 4294966272  ;;  %v247_v0 = vld [vmem:[#allocation6 + $0x38] sm:$0xff]  ;;  %v246_v1 = vld [vmem:[#allocation6 + $0x30] sm:$0xff]  ;;  %s354_s0 = smov [#allocation8]   ;;  %s184_s23 = sshll.u32 %s390_s2, 4  ;;  %s185_s23 = int_to_ptr.hbm [resolvable:$true] %s184_s23 }
   0xd   :  { %136 = vmatpush.bf16.msra.mxu0 %v247_v0  ;;  %259 = vmatpush.bf16.msra.mxu1 %v247_v0  ;;  %v245_v2 = vld [vmem:[#allocation6 + $0x28] sm:$0xff]  ;;  %v244_v3 = vld [vmem:[#allocation6 + $0x20] sm:$0xff]  ;;  %v243_v4 = vld [vmem:[#allocation6 + $0x18] sm:$0xff]  ;;  %s182_s1 = sshll.u32 %s354_s0, 4  ;;  %s183_s1 = int_to_ptr.vmem [resolvable:$true] %s182_s1 }
   0xe   :  { %v242_v5 = vld [vmem:[#allocation6 + $0x10] sm:$0xff]  ;;  %v241_v6 = vld [vmem:[#allocation6 + $0x8] sm:$0xff]  ;;  %v240_v7 = vld [vmem:[#allocation6] sm:$0xff] }
   0xf   :  { %v238_v8 = vld [vmem:[#allocation3] sm:$0xff]  ;;  %v239_v9 = vld [vmem:[#allocation3 + $0x8] sm:$0xff] }
  0x11   :  { %137 = vmatpush.bf16.msra.mxu0 %v246_v1  ;;  %260 = vmatpush.bf16.msra.mxu1 %v246_v1 }
  0x15   :  { %138 = vmatpush.bf16.msra.mxu0 %v245_v2  ;;  %261 = vmatpush.bf16.msra.mxu1 %v245_v2 }
  0x19   :  { %139 = vmatpush.bf16.msra.mxu0 %v244_v3  ;;  %262 = vmatpush.bf16.msra.mxu1 %v244_v3 }
  0x1d   :  { %140 = vmatpush.bf16.msra.mxu0 %v243_v4  ;;  %263 = vmatpush.bf16.msra.mxu1 %v243_v4 }
  0x21   :  { %141 = vmatpush.bf16.msra.mxu0 %v242_v5  ;;  %264 = vmatpush.bf16.msra.mxu1 %v242_v5 }
  0x25   :  { %142 = vmatpush.bf16.msra.mxu0 %v241_v6  ;;  %265 = vmatpush.bf16.msra.mxu1 %v241_v6 }
  0x29   :  { %143 = vmatpush.bf16.msra.mxu0 %v240_v7  ;;  %266 = vmatpush.bf16.msra.mxu1 %v240_v7 }
  0x2c   :  { %144 = vmatmul.bf16.vlgmr.msra.gmra.mxu0 %v238_v8  ;;  %149 = vmatmul.bf16.vlgmr.msra.gmra.mxu1 %v239_v9 }
  0xa9   :  { %v145_v10 = vpop.f32.mrf.mxu0  ;;  %v150_v11 = vpop.f32.mrf.mxu1 }
  0xb1   :  { %v147_v12 = vpop.f32.mrf.mxu0  ;;  %v152_v13 = vpop.f32.mrf.mxu1 }
  0xb2   :  { %v251_v14 = vpack.c.bf16 %v147_v12, %v145_v10  ;;  %v256_v15 = vpack.c.bf16 %v152_v13, %v150_v11 }
  0xb4   :  { %252 = vst [vmem:[#allocation8] sm:$0xff] %v251_v14  }
  0xb5   :  { %258 = vst [vmem:[#allocation8 + $0x8] sm:$0xff] %v256_v15  }
  0xb6   :  { %190 = dma.vmem_to_hbm [thread:$0]  %s183_s1, 256, %s185_s23, [#allocation5], %s351_s17, %s351_s17, %s352_s18  }
  0xb7   :  { %348 = dma.done.wait [#allocation5], 256  }
  0xb8   :  { %349 = vsyncadd [#allocation5], 4294967040 }
  0xb9   :  { %195 = vsyncpa [#allocation4], 1 }
  0xba   :  { %196 = vsyncpa [#allocation7], 1 }
  0xbb   :  { %197 = vsyncpa [#allocation5], 1 }

</bundles_post_ra>
